<compile_context>
chip_gen: v5e
topology: v5e:2x2
jax: 0.10.0
libtpu: 0.0.40
codegen_flags: <defaults>
</compile_context>

<pallas_src>
import math

import jax
import jax.numpy as jnp
from jax.experimental import pallas as pl
from jax.experimental.pallas import tpu as pltpu

CHAR_EMBED = 30  # fixed by the module: nn.Embedding(char_size, 30)


def _round_up(x, m):
    return ((x + m - 1) // m) * m


def _cdiv(a, b):
    return (a + b - 1) // b


def _char_embed_kernel(idx_ref, sel_ref, lanemod_ref, w_hi_ref, w_lo_ref, out_ref):
    # idx_ref     : (R, P)   f32   packed char ids (small exact integers < V_pad)
    # sel_ref     : (P, K)   bf16  sel[p, k] = 1 iff k // V_pad == p
    # lanemod_ref : (1, K)   f32   lanemod[k] = k % V_pad
    # w_hi/w_lo   : (K, N)   bf16  hi/lo split of fused block-diagonal weight
    # out_ref     : (R, N)   f32   PACK tokens packed per dense 128-lane row

    # Spread each packed char id across its V_pad-wide lane block with one small
    # bf16 MXU matmul (exact: ids < 256 and sel is 0/1, f32 accumulation), then
    # build the one-hot with a SINGLE full-width compare.
    idx_b = idx_ref[...].astype(jnp.bfloat16)          # tiny (R, P) cast
    targets = jnp.dot(idx_b, sel_ref[...], preferred_element_type=jnp.float32)
    onehot = jnp.where(targets == lanemod_ref[...], 1.0, 0.0).astype(jnp.bfloat16)

    # bf16 MXU path; hi+lo split keeps near-f32 accuracy (one-hot is exact 0/1,
    # accumulation is f32 via preferred_element_type -> precision is explicit).
    acc = jnp.dot(onehot, w_hi_ref[...], preferred_element_type=jnp.float32)
    acc = acc + jnp.dot(onehot, w_lo_ref[...], preferred_element_type=jnp.float32)
    out_ref[...] = acc.astype(out_ref.dtype)


def char_embeddings_forward(x_idx, embed_table, proj_weight, *, tile_tokens=8192):
    """x_idx: (B, S, n_chars) int; returns (B, S, hidden) f32."""
    B, S, n_chars = x_idx.shape
    V, E0 = embed_table.shape
    assert E0 == CHAR_EMBED
    H, E = proj_weight.shape
    assert E == n_chars * CHAR_EMBED, "embed_size must equal n_chars * 30"

    # ---- output packing: PACK tokens per dense 128-lane row when H | 128;
    # otherwise pad the output width to a 128 multiple and slice in the wrapper.
    if H < 128 and 128 % H == 0:
        pack, H_pad = 128 // H, H
    else:
        pack, H_pad = 1, _round_up(H, 128)
    P = pack * n_chars          # packed char-id columns per row
    N = pack * H_pad            # output lanes per row (multiple of 128)

    # ---- pad per-char vocab so K = P * V_pad is a multiple of 128.
    V_pad = _round_up(V, 128 // math.gcd(P, 128))
    K = P * V_pad

    # ---- fuse Embedding into the Linear weight (one-time, tiny, HIGHEST prec):
    #   fused[c, v, h] = sum_e table[v, e] * W[h, c*30 + e]
    w3 = proj_weight.reshape(H, n_chars, CHAR_EMBED).astype(jnp.float32)
    fused = jnp.einsum(
        "ve,hce->cvh",
        embed_table.astype(jnp.float32),
        w3,
        precision=jax.lax.Precision.HIGHEST,
    )
    fused = jnp.pad(fused, ((0, 0), (0, V_pad - V), (0, H_pad - H)))
    fused2d = fused.reshape(n_chars * V_pad, H_pad)
    # Block-diagonal replication: PACK packed tokens -> one dense output row.
    if pack > 1:
        w_packed = jnp.kron(jnp.eye(pack, dtype=jnp.float32), fused2d)
    else:
        w_packed = fused2d
    # hi/lo bf16 split -> two single-pass bf16 MXU matmuls, near-f32 accuracy.
    w_hi = w_packed.astype(jnp.bfloat16)
    w_lo = (w_packed - w_hi.astype(jnp.float32)).astype(jnp.bfloat16)

    # ---- constants for the single-compare one-hot build.
    k_iota = jnp.arange(K, dtype=jnp.int32)
    sel = (k_iota[None, :] // V_pad == jnp.arange(P, dtype=jnp.int32)[:, None]
           ).astype(jnp.bfloat16)                             # (P, K)
    lanemod = (k_iota % V_pad).astype(jnp.float32)[None, :]   # (1, K)

    # ---- token tiling: rows of `pack` tokens, sublane-aligned; big tiles to
    # amortize per-step overhead, but keep >=2 grid steps (v7x megacore).
    T = B * S
    unit = 8 * pack                                   # tokens per aligned row-group
    units_total = _cdiv(T, unit)
    units_per_tile = max(1, min(tile_tokens // unit, units_total))
    if units_total >= 2:
        units_per_tile = min(units_per_tile, _cdiv(units_total, 2))
    tile_t = units_per_tile * unit
    grid = (_cdiv(units_total, units_per_tile),)
    T_pad = grid[0] * tile_t
    rows_tile = tile_t // pack

    idx2d = x_idx.reshape(T, n_chars).astype(jnp.int32)
    if T_pad != T:
        idx2d = jnp.pad(idx2d, ((0, T_pad - T), (0, 0)))  # pad tokens use id 0
    # f32 carries the small integer ids exactly; no in-kernel offset adds needed.
    idx_packed = idx2d.reshape(T_pad // pack, P).astype(jnp.float32)

    out_packed = pl.pallas_call(
        _char_embed_kernel,
        out_shape=jax.ShapeDtypeStruct((T_pad // pack, N), jnp.float32),
        grid=grid,
        in_specs=[
            pl.BlockSpec((rows_tile, P), lambda i: (i, 0)),
            # Resident operands (constant index_map -> fetched once, no re-DMA).
            pl.BlockSpec((P, K), lambda i: (0, 0)),
            pl.BlockSpec((1, K), lambda i: (0, 0)),
            pl.BlockSpec((K, N), lambda i: (0, 0)),
            pl.BlockSpec((K, N), lambda i: (0, 0)),
        ],
        out_specs=pl.BlockSpec((rows_tile, N), lambda i: (i, 0)),
        compiler_params=pltpu.CompilerParams(
            dimension_semantics=("parallel",),
            vmem_limit_bytes=32 * 1024 * 1024,
        ),
    )(idx_packed, sel, lanemod, w_hi, w_lo)

    out = out_packed.reshape(T_pad, H_pad)[:T, :H]
    return out.reshape(B, S, H)


def _reference_forward(x_idx, embed_table, proj_weight):
    B, S, n_chars = x_idx.shape
    emb = embed_table[x_idx].reshape(B, S, n_chars * CHAR_EMBED)
    return jnp.einsum(
        "bse,he->bsh", emb, proj_weight, precision=jax.lax.Precision.HIGHEST
    )


if __name__ == "__main__":
    # Small shapes consistent with the module's forward:
    #   char_size=50, n_chars=4 -> embed_size=120, hidden_size=32, batch=2, seq=8
    char_size = 50
    n_chars = 4
    embed_size = n_chars * CHAR_EMBED  # 120
    hidden_size = 32
    B, S = 2, 8

    key = jax.random.PRNGKey(0)
    k_idx, k_tab, k_w = jax.random.split(key, 3)

    x_idx = jax.random.randint(k_idx, (B, S, n_chars), 0, char_size, dtype=jnp.int32)
    embed_table = jax.random.normal(k_tab, (char_size, CHAR_EMBED), dtype=jnp.float32)
    # nn.Linear(embed_size, hidden_size, bias=False).weight has shape (hidden, embed)
    proj_weight = (
        jax.random.normal(k_w, (hidden_size, embed_size), dtype=jnp.float32)
        / jnp.sqrt(embed_size)
    )

    out = char_embeddings_forward(x_idx, embed_table, proj_weight)
    out = jax.block_until_ready(out)

    ref = _reference_forward(x_idx, embed_table, proj_weight)
    assert out.shape == (B, S, hidden_size)
    assert jnp.allclose(out, ref, atol=2e-4, rtol=2e-4), "mismatch vs reference"

    print("KERNEL_OK")
</pallas_src>

<mosaic_0001>
module attributes {stable_mosaic.version = 11 : i64} {
  func.func @_char_embed_kernel(%arg0: i32, %arg1: memref<8x16xf32, #tpu.memory_space<vmem>>, %arg2: memref<16x896xbf16, #tpu.memory_space<vmem>>, %arg3: memref<1x896xf32, #tpu.memory_space<vmem>>, %arg4: memref<896x128xbf16, #tpu.memory_space<vmem>>, %arg5: memref<896x128xbf16, #tpu.memory_space<vmem>>, %arg6: memref<8x128xf32, #tpu.memory_space<vmem>>) attributes {dimension_semantics = [#tpu.dimension_semantics<parallel>], iteration_bounds = array<i64: 1>, scalar_prefetch = 0 : i64, scratch_operands = 0 : i64, tpu.core_type = #tpu.core_type<tc>, window_params = [{transform_indices = @transform_0, window_bounds = array<i64: 8, 16>}, {pipeline_mode = #tpu.pipeline_mode<synchronous>, transform_indices = @transform_1, window_bounds = array<i64: 16, 896>}, {pipeline_mode = #tpu.pipeline_mode<synchronous>, transform_indices = @transform_2, window_bounds = array<i64: 1, 896>}, {pipeline_mode = #tpu.pipeline_mode<synchronous>, transform_indices = @transform_3, window_bounds = array<i64: 896, 128>}, {pipeline_mode = #tpu.pipeline_mode<synchronous>, transform_indices = @transform_4, window_bounds = array<i64: 896, 128>}, {transform_indices = @transform_5, window_bounds = array<i64: 8, 128>}]} {
    %c0 = arith.constant 0 : index
    %c0_0 = arith.constant 0 : index
    %0 = vector.load %arg1[%c0, %c0_0] : memref<8x16xf32, #tpu.memory_space<vmem>>, vector<8x16xf32>
    %1 = arith.truncf %0 : vector<8x16xf32> to vector<8x16xbf16>
    %c0_1 = arith.constant 0 : index
    %c0_2 = arith.constant 0 : index
    %2 = vector.load %arg2[%c0_1, %c0_2] : memref<16x896xbf16, #tpu.memory_space<vmem>>, vector<16x896xbf16>
    %cst = arith.constant dense<0.000000e+00> : vector<8x896xf32>
    %3 = tpu.matmul %1, %2, %cst {dimension_numbers = #tpu.dot_dimension_numbers<[1], [0], [0], [1], [0, 0, 1, 1], [], []>} : vector<8x16xbf16>, vector<16x896xbf16>, vector<8x896xf32> -> vector<8x896xf32>
    %c0_3 = arith.constant 0 : index
    %c0_4 = arith.constant 0 : index
    %4 = vector.load %arg3[%c0_3, %c0_4] : memref<1x896xf32, #tpu.memory_space<vmem>>, vector<1x896xf32>
    %5 = vector.broadcast %4 : vector<1x896xf32> to vector<8x896xf32>
    %6 = arith.cmpf oeq, %3, %5 : vector<8x896xf32>
    %cst_5 = arith.constant 1.000000e+00 : f32
    %cst_6 = arith.constant 0.000000e+00 : f32
    %7 = vector.broadcast %cst_5 : f32 to vector<8x896xf32>
    %8 = vector.broadcast %cst_6 : f32 to vector<8x896xf32>
    %9 = arith.select %6, %7, %8 : vector<8x896xi1>, vector<8x896xf32>
    %10 = arith.truncf %9 : vector<8x896xf32> to vector<8x896xbf16>
    %c0_7 = arith.constant 0 : index
    %c0_8 = arith.constant 0 : index
    %11 = vector.load %arg4[%c0_7, %c0_8] : memref<896x128xbf16, #tpu.memory_space<vmem>>, vector<896x128xbf16>
    %cst_9 = arith.constant dense<0.000000e+00> : vector<8x128xf32>
    %12 = tpu.matmul %10, %11, %cst_9 {dimension_numbers = #tpu.dot_dimension_numbers<[1], [0], [0], [1], [0, 0, 1, 1], [], []>} : vector<8x896xbf16>, vector<896x128xbf16>, vector<8x128xf32> -> vector<8x128xf32>
    %c0_10 = arith.constant 0 : index
    %c0_11 = arith.constant 0 : index
    %13 = vector.load %arg5[%c0_10, %c0_11] : memref<896x128xbf16, #tpu.memory_space<vmem>>, vector<896x128xbf16>
    %cst_12 = arith.constant dense<0.000000e+00> : vector<8x128xf32>
    %14 = tpu.matmul %10, %13, %cst_12 {dimension_numbers = #tpu.dot_dimension_numbers<[1], [0], [0], [1], [0, 0, 1, 1], [], []>} : vector<8x896xbf16>, vector<896x128xbf16>, vector<8x128xf32> -> vector<8x128xf32>
    %15 = arith.addf %12, %14 : vector<8x128xf32>
    %c0_13 = arith.constant 0 : index
    %c0_14 = arith.constant 0 : index
    %16 = vector.load %arg6[%c0_13, %c0_14] : memref<8x128xf32, #tpu.memory_space<vmem>>, vector<8x128xf32>
    tpu.vector_store %arg6[%c0_13, %c0_14], %15 {strides = array<i32>} : memref<8x128xf32, #tpu.memory_space<vmem>>, vector<8x128xf32>,
    return
  }
  func.func @transform_0(%arg0: i32) -> (i32, i32) {
    %c0_i32 = arith.constant 0 : i32
    %c0_i32_0 = arith.constant 0 : i32
    return %arg0, %c0_i32 : i32, i32
  }
  func.func @transform_1(%arg0: i32) -> (i32, i32) {
    %c0_i32 = arith.constant 0 : i32
    %c0_i32_0 = arith.constant 0 : i32
    %c0_i32_1 = arith.constant 0 : i32
    return %c0_i32, %c0_i32_0 : i32, i32
  }
  func.func @transform_2(%arg0: i32) -> (i32, i32) {
    %c0_i32 = arith.constant 0 : i32
    %c0_i32_0 = arith.constant 0 : i32
    %c0_i32_1 = arith.constant 0 : i32
    return %c0_i32, %c0_i32_0 : i32, i32
  }
  func.func @transform_3(%arg0: i32) -> (i32, i32) {
    %c0_i32 = arith.constant 0 : i32
    %c0_i32_0 = arith.constant 0 : i32
    %c0_i32_1 = arith.constant 0 : i32
    return %c0_i32, %c0_i32_0 : i32, i32
  }
  func.func @transform_4(%arg0: i32) -> (i32, i32) {
    %c0_i32 = arith.constant 0 : i32
    %c0_i32_0 = arith.constant 0 : i32
    %c0_i32_1 = arith.constant 0 : i32
    return %c0_i32, %c0_i32_0 : i32, i32
  }
  func.func @transform_5(%arg0: i32) -> (i32, i32) {
    %c0_i32 = arith.constant 0 : i32
    %c0_i32_0 = arith.constant 0 : i32
    return %arg0, %c0_i32 : i32, i32
  }
}

</mosaic_0001>

<bundles_post_ra>
// kernel: tpu_custom_call.1
= control target key start
LH: loop header
LB: loop body
LE: loop exit
PB: predicated region body
PF: predicated region fallthrough
CT: control target
= control target key end

     0   :  { %10 = vsyncpa [#allocation3], 0  ;;  %s2382_s0 = inlined_call_operand.hbm [shape: f32[8,16], index: 0, kind: input, shape index: {}]   ;;  %s2383_s1 = inlined_call_operand.hbm [shape: bf16[16,896], index: 1, kind: input, shape index: {}]   ;;  %s2384_s2 = inlined_call_operand.hbm [shape: f32[1,896], index: 2, kind: input, shape index: {}]   ;;  %s2385_s3 = inlined_call_operand.hbm [shape: bf16[896,128], index: 3, kind: input, shape index: {}]   ;;  %s2386_s4 = inlined_call_operand.hbm [shape: bf16[896,128], index: 4, kind: input, shape index: {}]   ;;  %s2387_s5 = inlined_call_operand.hbm [shape: f32[8,128], index: 5, kind: output, shape index: {}]  }
   0x1   :  { %11 = vsyncpa [#allocation6], 0 }
   0x2   :  { %12 = vsyncpa [#allocation9], 0  ;;  %s29_s20 = sshll.u32 %s2383_s1, 4  ;;  %s30_s20 = int_to_ptr.hbm [resolvable:$true] %s29_s20 }
   0x3   :  { %13 = vsyncpa [#allocation4], 0  ;;  %s2165_s21 = smov [#allocation5]   ;;  %s53_s25 = sshll.u32 %s2385_s3, 4  ;;  %s54_s25 = int_to_ptr.hbm [resolvable:$true] %s53_s25 }
   0x4   :  { %s31_s22 = sshll.u32 %s2165_s21, 4  ;;  %s2166_s26 = smov 448   ;;  %s32_s22 = int_to_ptr.vmem [resolvable:$true] %s31_s22 }
   0x5   :  { %s2167_s27 = smov 28   ;;  %s2168_s28 = smov [#allocation8]  }
   0x6   :  { %37 = dma.hbm_to_vmem [thread:$0]  %s30_s20, 896, %s32_s22, [#allocation6], %s2166_s26, %s2166_s26, %s2167_s27  }
   0x7   :  { %s55_s29 = sshll.u32 %s2168_s28, 4  ;;  %s2169_s30 = smov 64   ;;  %s56_s29 = int_to_ptr.vmem [resolvable:$true] %s55_s29 }
   0x8   :  { %s2170_s6 = smov 4   ;;  %s19_s8 = sshll.u32 %s2382_s0, 4  ;;  %s20_s8 = int_to_ptr.hbm [resolvable:$true] %s19_s8 }
   0x9   :  { %61 = dma.hbm_to_vmem [thread:$0]  %s54_s25, 7168, %s56_s29, [#allocation9], %s2169_s30, %s2169_s30, %s2170_s6  }
   0xa   :  { %s2171_s9 = smov [#allocation2]   ;;  %s43_s12 = sshll.u32 %s2384_s2, 4  ;;  %s44_s12 = int_to_ptr.hbm [resolvable:$true] %s43_s12 }
   0xb   :  { %s21_s10 = sshll.u32 %s2171_s9, 4  ;;  %s2172_s13 = smov [#allocation7]   ;;  %s22_s10 = int_to_ptr.vmem [resolvable:$true] %s21_s10 }
   0xc   :  { %24 = dma.hbm_to_vmem [thread:$0]  %s20_s8, 128, %s22_s10, [#allocation3]  }
   0xd   :  { %s45_s14 = sshll.u32 %s2172_s13, 4  ;;  %s66_s17 = sshll.u32 %s2386_s4, 4  ;;  %s46_s14 = int_to_ptr.vmem [resolvable:$true] %s45_s14  ;;  %s67_s17 = int_to_ptr.hbm [resolvable:$true] %s66_s17 }
   0xe   :  { %48 = dma.hbm_to_vmem [thread:$0]  %s44_s12, 112, %s46_s14, [#allocation6]  }
   0xf   :  { %s2173_s0 = smov [#allocation10]  }
  0x10   :  { %s68_s18 = sshll.u32 %s2173_s0, 4  ;;  %s69_s18 = int_to_ptr.vmem [resolvable:$true] %s68_s18 }
  0x11   :  { %74 = dma.hbm_to_vmem [thread:$0]  %s67_s17, 7168, %s69_s18, [#allocation9], %s2169_s30, %s2169_s30, %s2170_s6  }
  0x12   :  { %2157 = dma.done.wait [#allocation3], 128  }
  0x13   :  { %2158 = vsyncadd [#allocation3], 4294967168 }
  0x14   :  { %2159 = dma.done.wait [#allocation6], 1008  }
  0x15   :  { %2160 = vsyncadd [#allocation6], 4294966288 }
  0x16   :  { %2161 = dma.done.wait [#allocation9], 14336  }
  0x17   :  { %2162 = vsyncadd [#allocation9], 4294952960  ;;  %v1374_v0 = vld [vmem:[#allocation5] sm:$0xf]  ;;  %v1886_v1 = vld [vmem:[#allocation5 + $0x18] sm:$0xf0] }
  0x18   :  { %v1382_v2 = vld [vmem:[#allocation5 + $0x8] sm:$0xf]  ;;  %v1375_v3 = vor.u32 %v1886_v1, %v1374_v0  ;;  %v1887_v4 = vld [vmem:[#allocation5 + $0x20] sm:$0xf0]  ;;  %v1884_v5 = vld [vmem:[#allocation5 + $0xc] sm:$0xf] }
  0x19   :  { %v1384_v6 = vld [vmem:[#allocation5 + $0x24] sm:$0xf0]  ;;  %v1383_v7 = vor.u32 %v1887_v4, %v1382_v2  ;;  %v96_v9 = vld [vmem:[#allocation2] sm:$0xff]  ;;  %vm142_vm0 = vcmask 130048   ;;  %v1883_v10 = vld [vmem:[#allocation5 + $0x4] sm:$0xf] }
  0x1a   :  { %v1387_v8 = vor.u32 %v1884_v5, %v1384_v6  ;;  %v1376_v11 = vld [vmem:[#allocation5 + $0x1c] sm:$0xf0]  ;;  %153 = vmatpush.bf16.msra.mxu1 %v1375_v3  ;;  %v2221_v12 = vpack.c.bf16 %v96_v9, %v96_v9  ;;  %v1390_v14 = vld [vmem:[#allocation5 + $0x10] sm:$0xf]  ;;  %v1888_v15 = vld [vmem:[#allocation5 + $0x28] sm:$0xf0] }
  0x1b   :  { %v1379_v13 = vor.u32 %v1883_v10, %v1376_v11  ;;  %v1398_v16 = vld [vmem:[#allocation5 + $0x18] sm:$0xf]  ;;  %179 = vmatpush.bf16.msra.mxu2 %v1383_v7  ;;  %v1391_v17 = vor.u32 %v1888_v15, %v1390_v14  ;;  %v1889_v18 = vld [vmem:[#allocation5 + $0x30] sm:$0xf0]  ;;  %v1392_v20 = vld [vmem:[#allocation5 + $0x2c] sm:$0xf0] }
  0x1c   :  { %192 = vmatpush.bf16.msra.mxu3 %v1387_v8  ;;  %v1885_v19 = vld [vmem:[#allocation5 + $0x14] sm:$0xf]  ;;  %v1399_v21 = vor.u32 %v1889_v18, %v1398_v16  ;;  %v1953_v23 = vld [vmem:[#allocation10 + $0x38] sm:$0xff]  ;;  %v1951_v29 = vld [vmem:[#allocation10 + $0x28] sm:$0xff]  ;;  %s2175_s2 = smov [#allocation11]   ;;  %s1360_s21 = sshll.u32 %s2387_s5, 4  ;;  %s1361_s21 = int_to_ptr.hbm [resolvable:$true] %s1360_s21 }
  0x1d   :  { %v1395_v22 = vor.u32 %v1885_v19, %v1392_v20  ;;  %1400 = vmatmul.msk.bf16.vlgmr.msra.gmra.mxu1 %vm142_vm0, %v2221_v12  ;;  %205 = vmatpush.bf16.msra.mxu0 %v1391_v17  ;;  %v1977_v24 = vld [vmem:[#allocation10 + $0xf8] sm:$0xff]  ;;  %v1952_v25 = vld [vmem:[#allocation10 + $0x30] sm:$0xff]  ;;  %v1975_v30 = vld [vmem:[#allocation10 + $0xe8] sm:$0xff]  ;;  %s1358_s4 = sshll.u32 %s2175_s2, 4  ;;  %s1359_s4 = int_to_ptr.vmem [resolvable:$true] %s1358_s4 }
  0x1e   :  { %166 = vmatpush.bf16.msrb.mxu1 %v1379_v13  ;;  %1402 = vmatmul.msk.bf16.vlgmr.msra.gmra.mxu2 %vm142_vm0, %v2221_v12  ;;  %v1961_v26 = vld [vmem:[#allocation10 + $0x78] sm:$0xff]  ;;  %v1976_v27 = vld [vmem:[#allocation10 + $0xf0] sm:$0xff]  ;;  %v1959_v31 = vld [vmem:[#allocation10 + $0x68] sm:$0xff] }
  0x1f   :  { %1403 = vmatmul.msk.bf16.vlgmr.msra.gmra.mxu3 %vm142_vm0, %v2221_v12  ;;  %231 = vmatpush.bf16.msrb.mxu2 %v1399_v21  ;;  %v1960_v28 = vld [vmem:[#allocation10 + $0x70] sm:$0xff]  ;;  %v1950_v32 = vld [vmem:[#allocation10 + $0x20] sm:$0xff]  ;;  %v1969_v34 = vld [vmem:[#allocation10 + $0xb8] sm:$0xff] }
  0x20   :  { %1404 = vmatmul.msk.bf16.vlgmr.msra.gmra.mxu0 %vm142_vm0, %v2221_v12  ;;  %834 = vmatpush.bf16.msrb.mxu3 %v1953_v23  ;;  %v1974_v33 = vld [vmem:[#allocation10 + $0xe0] sm:$0xff]  ;;  %v1949_v36 = vld [vmem:[#allocation10 + $0x18] sm:$0xff]  ;;  %v1968_v38 = vld [vmem:[#allocation10 + $0xb0] sm:$0xff] }
  0x21   :  { %847 = vmatpush.bf16.msrb.mxu0 %v1961_v26  ;;  %v1958_v35 = vld [vmem:[#allocation10 + $0x60] sm:$0xff]  ;;  %v1973_v37 = vld [vmem:[#allocation10 + $0xd8] sm:$0xff]  ;;  %v1948_v40 = vld [vmem:[#allocation10 + $0x10] sm:$0xff] }
  0x22   :  { %218 = vmatpush.bf16.msra.mxu1 %v1395_v22  ;;  %v1957_v39 = vld [vmem:[#allocation10 + $0x58] sm:$0xff]  ;;  %v1972_v41 = vld [vmem:[#allocation10 + $0xd0] sm:$0xff]  ;;  %v1967_v42 = vld [vmem:[#allocation10 + $0xa8] sm:$0xff] }
  0x23   :  { %873 = vmatpush.bf16.msra.mxu2 %v1977_v24  ;;  %v1956_v43 = vld [vmem:[#allocation10 + $0x50] sm:$0xff]  ;;  %v1947_v44 = vld [vmem:[#allocation10 + $0x8] sm:$0xff]  ;;  %v1966_v46 = vld [vmem:[#allocation10 + $0xa0] sm:$0xff] }
  0x24   :  { %835 = vmatpush.bf16.msrb.mxu3 %v1952_v25  ;;  %v1971_v45 = vld [vmem:[#allocation10 + $0xc8] sm:$0xff]  ;;  %v1946_v48 = vld [vmem:[#allocation10] sm:$0xff]  ;;  %v1985_v49 = vld [vmem:[#allocation10 + $0x138] sm:$0xff] }
  0x25   :  { %848 = vmatpush.bf16.msrb.mxu0 %v1960_v28  ;;  %v1955_v47 = vld [vmem:[#allocation10 + $0x48] sm:$0xff]  ;;  %v1965_v50 = vld [vmem:[#allocation10 + $0x98] sm:$0xff]  ;;  %v1970_v51 = vld [vmem:[#allocation10 + $0xc0] sm:$0xff]  ;;  %v2174_v28 = vmov 1.0|1.0  }
  0x26   :  { %v1897_v52 = vld [vmem:[#allocation8 + $0x38] sm:$0xff]  ;;  %v1954_v53 = vld [vmem:[#allocation10 + $0x40] sm:$0xff]  ;;  %v1984_v55 = vld [vmem:[#allocation10 + $0x130] sm:$0xff] }
  0x27   :  { %874 = vmatpush.bf16.msra.mxu2 %v1976_v27  ;;  %v1993_v54 = vld [vmem:[#allocation10 + $0x178] sm:$0xff]  ;;  %v1964_v56 = vld [vmem:[#allocation10 + $0x90] sm:$0xff]  ;;  %v1983_v59 = vld [vmem:[#allocation10 + $0x128] sm:$0xff] }
  0x28   :  { %836 = vmatpush.bf16.msrb.mxu3 %v1951_v29  ;;  %v1896_v57 = vld [vmem:[#allocation8 + $0x30] sm:$0xff]  ;;  %v1963_v60 = vld [vmem:[#allocation10 + $0x88] sm:$0xff]  ;;  %v1982_v63 = vld [vmem:[#allocation10 + $0x120] sm:$0xff] }
  0x29   :  { %849 = vmatpush.bf16.msrb.mxu0 %v1959_v31  ;;  %v1992_v58 = vld [vmem:[#allocation10 + $0x170] sm:$0xff]  ;;  %v1895_v61 = vld [vmem:[#allocation8 + $0x28] sm:$0xff]  ;;  %v1962_v0 = vld [vmem:[#allocation10 + $0x80] sm:$0xff] }
  0x2a   :  { %v1991_v62 = vld [vmem:[#allocation10 + $0x168] sm:$0xff]  ;;  %v2001_v1 = vld [vmem:[#allocation10 + $0x1b8] sm:$0xff]  ;;  %v1894_v2 = vld [vmem:[#allocation8 + $0x20] sm:$0xff] }
  0x2b   :  { %875 = vmatpush.bf16.msra.mxu2 %v1975_v30  ;;  %v1981_v3 = vld [vmem:[#allocation10 + $0x118] sm:$0xff]  ;;  %v2000_v4 = vld [vmem:[#allocation10 + $0x1b0] sm:$0xff]  ;;  %v1999_v7 = vld [vmem:[#allocation10 + $0x1a8] sm:$0xff] }
  0x2c   :  { %837 = vmatpush.bf16.msrb.mxu3 %v1950_v32  ;;  %v1893_v5 = vld [vmem:[#allocation8 + $0x18] sm:$0xff]  ;;  %v1980_v6 = vld [vmem:[#allocation10 + $0x110] sm:$0xff]  ;;  %v1979_v8 = vld [vmem:[#allocation10 + $0x108] sm:$0xff] }
  0x2d   :  { %1401 = vmatmul.msk.bf16.vlgmr.msrb.gmra.mxu1 %vm142_vm0, %v2221_v12  ;;  %850 = vmatpush.bf16.msrb.mxu0 %v1958_v35  ;;  %v1998_v9 = vld [vmem:[#allocation10 + $0x1a0] sm:$0xff]  ;;  %v1997_v10 = vld [vmem:[#allocation10 + $0x198] sm:$0xff]  ;;  %v1996_v11 = vld [vmem:[#allocation10 + $0x190] sm:$0xff] }
  0x2e   :  { %1406 = vmatmul.msk.bf16.vlgmr.msrb.gmra.mxu2 %vm142_vm0, %v2221_v12  ;;  %860 = vmatpush.bf16.msrb.mxu1 %v1969_v34  ;;  %v1978_v13 = vld [vmem:[#allocation10 + $0x100] sm:$0xff]  ;;  %v1995_v15 = vld [vmem:[#allocation10 + $0x188] sm:$0xff]  ;;  %v1989_v17 = vld [vmem:[#allocation10 + $0x158] sm:$0xff] }
  0x2f   :  { %876 = vmatpush.bf16.msra.mxu2 %v1974_v33  ;;  %v1990_v14 = vld [vmem:[#allocation10 + $0x160] sm:$0xff]  ;;  %v1891_v16 = vld [vmem:[#allocation8 + $0x8] sm:$0xff]  ;;  %v1988_v20 = vld [vmem:[#allocation10 + $0x150] sm:$0xff] }
  0x30   :  { %838 = vmatpush.bf16.msrb.mxu3 %v1949_v36  ;;  %v1994_v18 = vld [vmem:[#allocation10 + $0x180] sm:$0xff]  ;;  %v1987_v21 = vld [vmem:[#allocation10 + $0x148] sm:$0xff]  ;;  %v2237_v23 = vld [vmem:[#allocation7] sm:$0xff] }
  0x31   :  { %851 = vmatpush.bf16.msrb.mxu0 %v1957_v39  ;;  %v1890_v19 = vld [vmem:[#allocation8] sm:$0xff]  ;;  %v239_v24 = vperm.slane %v2237_v23, 0  ;;  %v1905_v26 = vld [vmem:[#allocation8 + $0x78] sm:$0xff]  ;;  %v241_v30 = vperm.slane %v2237_v23, 2  ;;  %v242_v31 = vperm.slane %v2237_v23, 3  ;;  %v1904_v32 = vld [vmem:[#allocation8 + $0x70] sm:$0xff] }
  0x32   :  { %861 = vmatpush.bf16.msrb.mxu1 %v1968_v38  ;;  %v1986_v22 = vld [vmem:[#allocation10 + $0x140] sm:$0xff]  ;;  %v1921_v35 = vld [vmem:[#allocation8 + $0xf8] sm:$0xff]  ;;  %v1932_v27 = vld [vmem:[#allocation8 + $0x150] sm:$0xff] }
  0x33   :  { %877 = vmatpush.bf16.msra.mxu2 %v1973_v37  ;;  %v1929_v39 = vld [vmem:[#allocation8 + $0x138] sm:$0xff]  ;;  %v1939_v36 = vld [vmem:[#allocation8 + $0x188] sm:$0xff]  ;;  %v1938_v37 = vld [vmem:[#allocation8 + $0x180] sm:$0xff] }
  0x34   :  { %839 = vmatpush.bf16.msrb.mxu3 %v1948_v40  ;;  %v1903_v40 = vld [vmem:[#allocation8 + $0x68] sm:$0xff] }
  0x35   :  { %852 = vmatpush.bf16.msrb.mxu0 %v1956_v43 }
  0x36   :  { %862 = vmatpush.bf16.msrb.mxu1 %v1967_v42  ;;  %v1920_v42 = vld [vmem:[#allocation8 + $0xf0] sm:$0xff] }
  0x37   :  { %878 = vmatpush.bf16.msra.mxu2 %v1972_v41  ;;  %v243_v41 = vperm.slane %v2237_v23, 4 }
  0x38   :  { %840 = vmatpush.bf16.msrb.mxu3 %v1947_v44  ;;  %v1928_v44 = vld [vmem:[#allocation8 + $0x130] sm:$0xff] }
  0x39   :  { %853 = vmatpush.bf16.msrb.mxu0 %v1955_v47 }
  0x3a   :  { %863 = vmatpush.bf16.msrb.mxu1 %v1966_v46  ;;  %v240_v46 = vperm.slane %v2237_v23, 1 }
  0x3b   :  { %879 = vmatpush.bf16.msra.mxu2 %v1971_v45  ;;  %v1902_v45 = vld [vmem:[#allocation8 + $0x60] sm:$0xff] }
  0x3c   :  { %841 = vmatpush.bf16.msrb.mxu3 %v1946_v48 }
  0x3d   :  { %1405 = vmatmul.msk.bf16.vlgmr.msra.gmra.mxu1 %vm142_vm0, %v2221_v12  ;;  %854 = vmatpush.bf16.msrb.mxu0 %v1954_v53  ;;  %v1892_v12 = vld [vmem:[#allocation8 + $0x10] sm:$0xff] }
  0x3e   :  { %864 = vmatpush.bf16.msrb.mxu1 %v1965_v50 }
  0x3f   :  { %880 = vmatpush.bf16.msra.mxu2 %v1970_v51 }
  0x40   :  { %886 = vmatpush.bf16.msra.mxu3 %v1985_v49  ;;  %v1919_v49 = vld [vmem:[#allocation8 + $0xe8] sm:$0xff] }
  0x41   :  { %899 = vmatpush.bf16.msra.mxu0 %v1993_v54  ;;  %v1901_v54 = vld [vmem:[#allocation8 + $0x58] sm:$0xff] }
  0x42   :  { %865 = vmatpush.bf16.msrb.mxu1 %v1964_v56  ;;  %v1918_v56 = vld [vmem:[#allocation8 + $0xe0] sm:$0xff] }
  0x43   :  { %1261 = vmatpush.bf16.msrb.mxu2 %v1897_v52  ;;  %v1927_v52 = vld [vmem:[#allocation8 + $0x128] sm:$0xff] }
  0x44   :  { %887 = vmatpush.bf16.msra.mxu3 %v1984_v55  ;;  %v1913_v55 = vld [vmem:[#allocation8 + $0xb8] sm:$0xff] }
  0x45   :  { %900 = vmatpush.bf16.msra.mxu0 %v1992_v58  ;;  %v1926_v58 = vld [vmem:[#allocation8 + $0x120] sm:$0xff] }
  0x46   :  { %866 = vmatpush.bf16.msrb.mxu1 %v1963_v60  ;;  %v1912_v60 = vld [vmem:[#allocation8 + $0xb0] sm:$0xff] }
  0x47   :  { %1262 = vmatpush.bf16.msrb.mxu2 %v1896_v57  ;;  %v245_v57 = vperm.slane %v2237_v23, 6 }
  0x48   :  { %888 = vmatpush.bf16.msra.mxu3 %v1983_v59  ;;  %v1900_v59 = vld [vmem:[#allocation8 + $0x50] sm:$0xff] }
  0x49   :  { %901 = vmatpush.bf16.msra.mxu0 %v1991_v62  ;;  %v1917_v62 = vld [vmem:[#allocation8 + $0xd8] sm:$0xff] }
  0x4a   :  { %867 = vmatpush.bf16.msrb.mxu1 %v1962_v0 }
  0x4b   :  { %1263 = vmatpush.bf16.msrb.mxu2 %v1895_v61 }
  0x4c   :  { %889 = vmatpush.bf16.msra.mxu3 %v1982_v63 }
  0x4d   :  { %902 = vmatpush.bf16.msra.mxu0 %v1990_v14 }
  0x4e   :  { %912 = vmatpush.bf16.msra.mxu1 %v2001_v1  ;;  %v1925_v1 = vld [vmem:[#allocation8 + $0x118] sm:$0xff] }
  0x4f   :  { %1264 = vmatpush.bf16.msrb.mxu2 %v1894_v2  ;;  %v1899_v2 = vld [vmem:[#allocation8 + $0x48] sm:$0xff] }
  0x50   :  { %890 = vmatpush.bf16.msra.mxu3 %v1981_v3  ;;  %v1911_v3 = vld [vmem:[#allocation8 + $0xa8] sm:$0xff] }
  0x51   :  { %903 = vmatpush.bf16.msra.mxu0 %v1989_v17  ;;  %v1914_v17 = vld [vmem:[#allocation8 + $0xc0] sm:$0xff] }
  0x52   :  { %913 = vmatpush.bf16.msra.mxu1 %v2000_v4  ;;  %v1916_v4 = vld [vmem:[#allocation8 + $0xd0] sm:$0xff] }
  0x53   :  { %1265 = vmatpush.bf16.msrb.mxu2 %v1893_v5  ;;  %v1924_v5 = vld [vmem:[#allocation8 + $0x110] sm:$0xff] }
  0x54   :  { %891 = vmatpush.bf16.msra.mxu3 %v1980_v6  ;;  %v1898_v6 = vld [vmem:[#allocation8 + $0x40] sm:$0xff] }
  0x55   :  { %904 = vmatpush.bf16.msra.mxu0 %v1988_v20  ;;  %v1935_v20 = vld [vmem:[#allocation8 + $0x168] sm:$0xff] }
  0x56   :  { %914 = vmatpush.bf16.msra.mxu1 %v1999_v7  ;;  %v1910_v7 = vld [vmem:[#allocation8 + $0xa0] sm:$0xff] }
  0x57   :  { %1266 = vmatpush.bf16.msrb.mxu2 %v1892_v12 }
  0x58   :  { %892 = vmatpush.bf16.msra.mxu3 %v1979_v8  ;;  %v244_v8 = vperm.slane %v2237_v23, 5  ;;  %v1934_v23 = vld [vmem:[#allocation8 + $0x160] sm:$0xff] }
  0x59   :  { %905 = vmatpush.bf16.msra.mxu0 %v1987_v21 }
  0x5a   :  { %915 = vmatpush.bf16.msra.mxu1 %v1998_v9  ;;  %v1937_v9 = vld [vmem:[#allocation8 + $0x178] sm:$0xff] }
  0x5b   :  { %1267 = vmatpush.bf16.msrb.mxu2 %v1891_v16  ;;  %v1936_v16 = vld [vmem:[#allocation8 + $0x170] sm:$0xff] }
  0x5c   :  { %893 = vmatpush.bf16.msra.mxu3 %v1978_v13  ;;  %v1923_v13 = vld [vmem:[#allocation8 + $0x108] sm:$0xff] }
  0x5d   :  { %906 = vmatpush.bf16.msra.mxu0 %v1986_v22  ;;  %v1907_v22 = vld [vmem:[#allocation8 + $0x88] sm:$0xff] }
  0x5e   :  { %916 = vmatpush.bf16.msra.mxu1 %v1997_v10  ;;  %v1915_v10 = vld [vmem:[#allocation8 + $0xc8] sm:$0xff] }
  0x5f   :  { %1268 = vmatpush.bf16.msrb.mxu2 %v1890_v19  ;;  %v1908_v19 = vld [vmem:[#allocation8 + $0x90] sm:$0xff] }
  0x62   :  { %917 = vmatpush.bf16.msra.mxu1 %v1996_v11 }
  0x66   :  { %918 = vmatpush.bf16.msra.mxu1 %v1995_v15  ;;  %v1909_v15 = vld [vmem:[#allocation8 + $0x98] sm:$0xff] }
  0x6a   :  { %919 = vmatpush.bf16.msra.mxu1 %v1994_v18  ;;  %v1922_v18 = vld [vmem:[#allocation8 + $0x100] sm:$0xff] }
  0x9a   :  { %v155_v25 = vpop.f32.mrf.mxu1 }
  0x9b   :  { %vm2240_vm1 = vcmp.eq.f32.partialorder %v155_v25, %v239_v24  ;;  %v1906_v24 = vld [vmem:[#allocation8 + $0x80] sm:$0xff]  ;;  %v1933_v25 = vld [vmem:[#allocation8 + $0x158] sm:$0xff] }
  0x9c   :  { %vm1631_vm2 = vmpackc.low %vm2240_vm1, %vm2240_vm1 }
  0x9d   :  { %1632 = vmatmul.msk.bf16.vlgmr.msrb.gmra.mxu3 %vm1631_vm2, %v2174_v28  ;;  %v207_v29 = vpop.f32.mrf.mxu0 }
  0x9e   :  { %1274 = vmatpush.bf16.msrb.mxu3 %v1905_v26  ;;  %vm2283_vm7 = vcmp.eq.f32.partialorder %v207_v29, %v243_v41  ;;  %v1945_v26 = vld [vmem:[#allocation8 + $0x1b8] sm:$0xff]  ;;  %v1944_v29 = vld [vmem:[#allocation8 + $0x1b0] sm:$0xff] }
  0x9f   :  { %vm1639_vm9 = vmpackc.low %vm2283_vm7, %vm2283_vm7 }
  0xa1   :  { %v181_v33 = vpop.f32.mrf.mxu2 }
  0xa2   :  { %v194_v34 = vpop.f32.mrf.mxu3  ;;  %vm2255_vm3 = vcmp.eq.f32.partialorder %v181_v33, %v241_v30  ;;  %1275 = vmatpush.bf16.msrb.mxu3 %v1904_v32  ;;  %v157_v38 = vpop.f32.mrf.mxu1  ;;  %v1931_v30 = vld [vmem:[#allocation8 + $0x148] sm:$0xff]  ;;  %v1930_v32 = vld [vmem:[#allocation8 + $0x140] sm:$0xff] }
  0xa3   :  { %vm2259_vm4 = vcmp.eq.f32.partialorder %v194_v34, %v242_v31  ;;  %vm1635_vm5 = vmpackc.low %vm2255_vm3, %vm2255_vm3  ;;  %v1943_v31 = vld [vmem:[#allocation8 + $0x1a8] sm:$0xff]  ;;  %v1942_v33 = vld [vmem:[#allocation8 + $0x1a0] sm:$0xff] }
  0xa4   :  { %vm1637_vm6 = vmpackc.low %vm2259_vm4, %vm2259_vm4  ;;  %1636 = vmatmul.msk.bf16.vlgmr.msrb.gmra.mxu1 %vm1635_vm5, %v2174_v28  ;;  %v1941_v34 = vld [vmem:[#allocation8 + $0x198] sm:$0xff] }
  0xa5   :  { %1638 = vmatmul.msk.bf16.vlgmr.msra.gmra.mxu2 %vm1637_vm6, %v2174_v28  ;;  %1300 = vmatpush.bf16.msrb.mxu1 %v1921_v35  ;;  %v209_v43 = vpop.f32.mrf.mxu0  ;;  %v1940_v35 = vld [vmem:[#allocation8 + $0x190] sm:$0xff] }
  0xa6   :  { %1313 = vmatpush.bf16.msra.mxu2 %v1929_v39  ;;  %1276 = vmatpush.bf16.msrb.mxu3 %v1903_v40 }
  0xa9   :  { %v183_v48 = vpop.f32.mrf.mxu2  ;;  %1301 = vmatpush.bf16.msrb.mxu1 %v1920_v42 }
  0xaa   :  { %v196_v50 = vpop.f32.mrf.mxu3  ;;  %1314 = vmatpush.bf16.msra.mxu2 %v1928_v44  ;;  %1277 = vmatpush.bf16.msrb.mxu3 %v1902_v45  ;;  %v168_v51 = vpop.f32.mrf.mxu1 }
  0xab   :  { %vm2287_vm8 = vcmp.eq.f32.partialorder %v168_v51, %v240_v46 }
  0xac   :  { %vm1633_vm10 = vmpackc.low %vm2287_vm8, %vm2287_vm8 }
  0xad   :  { %1302 = vmatpush.bf16.msrb.mxu1 %v1919_v49  ;;  %1634 = vmatmul.msk.bf16.vlgmr.msrb.gmra.mxu0 %vm1633_vm10, %v2174_v28 }
  0xae   :  { %1315 = vmatpush.bf16.msra.mxu2 %v1927_v52  ;;  %1640 = vmatmul.msk.bf16.vlgmr.msra.gmra.mxu3 %vm1639_vm9, %v2174_v28 }
  0xaf   :  { %1278 = vmatpush.bf16.msrb.mxu3 %v1901_v54  ;;  %1287 = vmatpush.bf16.msrb.mxu0 %v1913_v55 }
  0xb1   :  { %v233_v61 = vpop.f32.mrf.mxu2  ;;  %1303 = vmatpush.bf16.msrb.mxu1 %v1918_v56 }
  0xb2   :  { %vm2310_vm11 = vcmp.eq.f32.partialorder %v233_v61, %v245_v57  ;;  %1316 = vmatpush.bf16.msra.mxu2 %v1926_v58  ;;  %v170_v0 = vpop.f32.mrf.mxu1 }
  0xb3   :  { %vm1643_vm12 = vmpackc.low %vm2310_vm11, %vm2310_vm11  ;;  %1279 = vmatpush.bf16.msrb.mxu3 %v1900_v59  ;;  %1288 = vmatpush.bf16.msrb.mxu0 %v1912_v60 }
  0xb4   :  { %1644 = vmatmul.msk.bf16.vlgmr.msra.gmra.mxu1 %vm1643_vm12, %v2174_v28 }
  0xb5   :  { %1870 = vmatmul.msk.bf16.vlgmr.msrb.gmra.mxu2 %vm1631_vm2, %v2174_v28  ;;  %1304 = vmatpush.bf16.msrb.mxu1 %v1917_v62 }
  0xb6   :  { %1317 = vmatpush.bf16.msra.mxu2 %v1925_v1 }
  0xb7   :  { %1280 = vmatpush.bf16.msrb.mxu3 %v1899_v2  ;;  %1289 = vmatpush.bf16.msrb.mxu0 %v1911_v3 }
  0xb9   :  { %1305 = vmatpush.bf16.msrb.mxu1 %v1916_v4  ;;  %v235_v11 = vpop.f32.mrf.mxu2 }
  0xba   :  { %1318 = vmatpush.bf16.msra.mxu2 %v1924_v5  ;;  %v220_v12 = vpop.f32.mrf.mxu1 }
  0xbb   :  { %1281 = vmatpush.bf16.msrb.mxu3 %v1898_v6  ;;  %1290 = vmatpush.bf16.msrb.mxu0 %v1910_v7  ;;  %vm2330_vm13 = vcmp.eq.f32.partialorder %v220_v12, %v244_v8 }
  0xbc   :  { %vm1641_vm14 = vmpackc.low %vm2330_vm13, %vm2330_vm13 }
  0xbd   :  { %1306 = vmatpush.bf16.msrb.mxu1 %v1915_v10  ;;  %1642 = vmatmul.msk.bf16.vlgmr.msra.gmra.mxu0 %vm1641_vm14, %v2174_v28 }
  0xbe   :  { %1319 = vmatpush.bf16.msra.mxu2 %v1923_v13  ;;  %1872 = vmatmul.msk.bf16.vlgmr.msrb.gmra.mxu3 %vm1633_vm10, %v2174_v28 }
  0xbf   :  { %1326 = vmatpush.bf16.msra.mxu3 %v1937_v9  ;;  %1291 = vmatpush.bf16.msrb.mxu0 %v1909_v15 }
  0xc1   :  { %1307 = vmatpush.bf16.msrb.mxu1 %v1914_v17 }
  0xc2   :  { %1320 = vmatpush.bf16.msra.mxu2 %v1922_v18  ;;  %v222_v21 = vpop.f32.mrf.mxu1 }
  0xc3   :  { %1327 = vmatpush.bf16.msra.mxu3 %v1936_v16  ;;  %1292 = vmatpush.bf16.msrb.mxu0 %v1908_v19 }
  0xc4   :  { %1876 = vmatmul.msk.bf16.vlgmr.msrb.gmra.mxu1 %vm1637_vm6, %v2174_v28 }
  0xc5   :  { %1878 = vmatmul.msk.bf16.vlgmr.msra.gmra.mxu2 %vm1639_vm9, %v2174_v28 }
  0xc7   :  { %1328 = vmatpush.bf16.msra.mxu3 %v1935_v20  ;;  %1293 = vmatpush.bf16.msrb.mxu0 %v1907_v22 }
  0xcb   :  { %1329 = vmatpush.bf16.msra.mxu3 %v1934_v23  ;;  %1294 = vmatpush.bf16.msrb.mxu0 %v1906_v24 }
  0xce   :  { %1874 = vmatmul.msk.bf16.vlgmr.msrb.gmra.mxu0 %vm1635_vm5, %v2174_v28 }
  0xcf   :  { %1330 = vmatpush.bf16.msra.mxu3 %v1933_v25  ;;  %1339 = vmatpush.bf16.msra.mxu0 %v1945_v26 }
  0xd3   :  { %1331 = vmatpush.bf16.msra.mxu3 %v1932_v27  ;;  %1340 = vmatpush.bf16.msra.mxu0 %v1944_v29 }
  0xd7   :  { %1332 = vmatpush.bf16.msra.mxu3 %v1931_v30  ;;  %1341 = vmatpush.bf16.msra.mxu0 %v1943_v31 }
  0xdb   :  { %1333 = vmatpush.bf16.msra.mxu3 %v1930_v32  ;;  %1342 = vmatpush.bf16.msra.mxu0 %v1942_v33 }
  0xde   :  { %1880 = vmatmul.msk.bf16.vlgmr.msra.gmra.mxu3 %vm1641_vm14, %v2174_v28 }
  0xdf   :  { %1343 = vmatpush.bf16.msra.mxu0 %v1941_v34 }
  0xe3   :  { %1344 = vmatpush.bf16.msra.mxu0 %v1940_v35 }
  0xe7   :  { %1345 = vmatpush.bf16.msra.mxu0 %v1939_v36 }
  0xeb   :  { %1346 = vmatpush.bf16.msra.mxu0 %v1938_v37 }
  0xee   :  { %1882 = vmatmul.msk.bf16.vlgmr.msra.gmra.mxu0 %vm1643_vm12, %v2174_v28 }
 0x120   :  { %v843_v38 = vpop.f32.mrf.mxu3 }
 0x121   :  { %v869_v39 = vpop.f32.mrf.mxu1 }
 0x128   :  { %v882_v40 = vpop.f32.mrf.mxu2  ;;  %v845_v41 = vpop.f32.mrf.mxu3 }
 0x129   :  { %v871_v42 = vpop.f32.mrf.mxu1 }
 0x12a   :  { %v856_v43 = vpop.f32.mrf.mxu0 }
 0x12b   :  { %v857_v53 = vadd.f32 %v856_v43, %v843_v38 }
 0x12d   :  { %v870_v28 = vadd.f32 %v869_v39, %v857_v53 }
 0x12f   :  { %v883_v58 = vadd.f32 %v882_v40, %v870_v28 }
 0x130   :  { %v884_v44 = vpop.f32.mrf.mxu2 }
 0x131   :  { %v895_v45 = vpop.f32.mrf.mxu3  ;;  %v921_v46 = vpop.f32.mrf.mxu1 }
 0x132   :  { %v858_v47 = vpop.f32.mrf.mxu0  ;;  %v896_v62 = vadd.f32 %v895_v45, %v883_v58 }
 0x138   :  { %v1270_v48 = vpop.f32.mrf.mxu2 }
 0x139   :  { %v897_v49 = vpop.f32.mrf.mxu3  ;;  %v923_v50 = vpop.f32.mrf.mxu1 }
 0x13a   :  { %v908_v51 = vpop.f32.mrf.mxu0 }
 0x13b   :  { %v909_v63 = vadd.f32 %v908_v51, %v896_v62 }
 0x13d   :  { %v922_v1 = vadd.f32 %v921_v46, %v909_v63 }
 0x13f   :  { %v1271_v3 = vadd.f32 %v1270_v48, %v922_v1 }
 0x140   :  { %v1272_v52 = vpop.f32.mrf.mxu2 }
 0x141   :  { %v1283_v54 = vpop.f32.mrf.mxu3  ;;  %v1309_v55 = vpop.f32.mrf.mxu1 }
 0x142   :  { %v910_v56 = vpop.f32.mrf.mxu0  ;;  %v1284_v4 = vadd.f32 %v1283_v54, %v1271_v3 }
 0x148   :  { %v1322_v57 = vpop.f32.mrf.mxu2 }
 0x149   :  { %v1285_v59 = vpop.f32.mrf.mxu3  ;;  %v1311_v60 = vpop.f32.mrf.mxu1 }
 0x14b   :  { %v1296_v61 = vpop.f32.mrf.mxu0 }
 0x14c   :  { %v1297_v5 = vadd.f32 %v1296_v61, %v1284_v4 }
 0x14e   :  { %v1310_v7 = vadd.f32 %v1309_v55, %v1297_v5 }
 0x150   :  { %v1324_v0 = vpop.f32.mrf.mxu2  ;;  %v1323_v8 = vadd.f32 %v1322_v57, %v1310_v7 }
 0x153   :  { %v1298_v2 = vpop.f32.mrf.mxu0 }
 0x161   :  { %v1335_v6 = vpop.f32.mrf.mxu3 }
 0x162   :  { %v1336_v10 = vadd.f32 %v1335_v6, %v1323_v8 }
 0x169   :  { %v1337_v9 = vpop.f32.mrf.mxu3 }
 0x16b   :  { %v1348_v11 = vpop.f32.mrf.mxu0 }
 0x16c   :  { %v1349_v12 = vadd.f32 %v1348_v11, %v1336_v10 }
 0x16e   :  { %1352 = vst [vmem:[#allocation11] sm:$0xff] %v1349_v12 }
 0x16f   :  { %1363 = dma.vmem_to_hbm [thread:$0]  %s1359_s4, 128, %s1361_s21, [#allocation4]  }
 0x173   :  { %v1350_v13 = vpop.f32.mrf.mxu0 }
 0x174   :  { %2163 = dma.done.wait [#allocation4], 128  }
 0x175   :  { %2164 = vsyncadd [#allocation4], 4294967168 }
 0x176   :  { %1368 = vsyncpa [#allocation3], 1 }
 0x177   :  { %1369 = vsyncpa [#allocation6], 1 }
 0x178   :  { %1370 = vsyncpa [#allocation9], 1 }
 0x179   :  { %1371 = vsyncpa [#allocation4], 1 }

</bundles_post_ra>
